<compile_context>
chip_gen: v5e
topology: v5e:2x2
jax: 0.10.0
libtpu: 0.0.40
codegen_flags: <defaults>
</compile_context>

<pallas_src>
from typing import NamedTuple

import numpy as np
import jax
import jax.numpy as jnp
from jax import lax
from jax.experimental import pallas as pl
from jax.experimental.pallas import tpu as pltpu


OUT_HW = 299        # Inception input resolution
LANE = 128


def _round_up(x: int, m: int) -> int:
    return ((x + m - 1) // m) * m


def _vmem_capacity_bytes() -> int:
    try:
        return int(pltpu.get_tpu_info().vmem_capacity_bytes)
    except Exception:
        return 64 << 20            # conservative (v7x) fallback


def bilinear_matrix(in_size: int, out_size: int) -> np.ndarray:
    """Interpolation matrix for align_corners=False bilinear (PyTorch default)."""
    i = np.arange(out_size, dtype=np.float64)
    src = (i + 0.5) * (in_size / out_size) - 0.5
    src = np.clip(src, 0.0, in_size - 1)
    lo = np.floor(src).astype(np.int64)
    hi = np.minimum(lo + 1, in_size - 1)
    w_hi = (src - lo).astype(np.float32)
    w_lo = 1.0 - w_hi
    m = np.zeros((out_size, in_size), dtype=np.float32)
    m[np.arange(out_size), lo] += w_lo
    m[np.arange(out_size), hi] += w_hi
    return m


# ---------------------------------------------------------------------------
# Fused feature head: normalize -> (resize+GAP+linear folded into one matrix).
# Grid over image tiles ("parallel" => megacore sharding on v7x).
# ---------------------------------------------------------------------------
def _feature_kernel(m_ref, b_ref, x_ref, o_ref):
    # x_ref: (tb, C*H*W) raw pixels in native dtype (uint8/bf16/f32), [0, 255].
    x = x_ref[...].astype(jnp.float32)                 # cast in-kernel (v5e: f32 VPU)
    xb = ((x - 127.5) * (1.0 / 127.5)).astype(jnp.bfloat16)
    # One MXU matmul per tile: (tb, C*H*W) @ (C*H*W, D_pad) -> f32 accumulate.
    o_ref[...] = (jnp.dot(xb, m_ref[...], preferred_element_type=jnp.float32)
                  + b_ref[...])


@jax.jit
def extract_features(images: jax.Array, m2: jax.Array, b_pad: jax.Array) -> jax.Array:
    n, c, h, w = images.shape
    k = c * h * w
    d_pad = m2.shape[1]

    x = images.reshape(n, k)                 # native dtype; no wrapper astype pass
    tb = min(128, _round_up(n, 8))           # batch images per grid step
    n_pad = _round_up(n, tb)
    if n_pad != n:
        x = jnp.pad(x, ((0, n_pad - n), (0, 0)))

    feats = pl.pallas_call(
        _feature_kernel,
        out_shape=jax.ShapeDtypeStruct((n_pad, d_pad), jnp.float32),
        grid=(n_pad // tb,),
        in_specs=[
            pl.BlockSpec((k, d_pad), lambda i: (0, 0)),    # folded head (constant)
            pl.BlockSpec((1, d_pad), lambda i: (0, 0)),    # bias + ones-lane
            pl.BlockSpec((tb, k), lambda i: (i, 0)),       # image tile
        ],
        out_specs=pl.BlockSpec((tb, d_pad), lambda i: (i, 0)),
        compiler_params=pltpu.CompilerParams(
            dimension_semantics=("parallel",)),
    )(m2, b_pad, x)
    return feats[:n]


# ---------------------------------------------------------------------------
# Tiled statistics: accumulate the augmented Gram G = F^T F in VMEM-resident
# output tiles (row-tiles parallel, N-tiles arbitrary); mu comes from the
# constant-1 lane's row of G, so no per-step XLU column sum is needed.
# ---------------------------------------------------------------------------
def _gram_kernel(fcol_ref, f_ref, g_ref):
    @pl.when(pl.program_id(1) == 0)
    def _():
        g_ref[...] = jnp.zeros_like(g_ref)
    # F[:, rows]^T @ F without an explicit transpose: contract axis 0 of both.
    g_ref[...] += lax.dot_general(
        fcol_ref[...], f_ref[...], (((0,), (0,)), ((), ())),
        preferred_element_type=jnp.float32)


def compute_statistics(feats_pad: jax.Array, d_out: int, ones_lane: int):
    n, d_pad = feats_pad.shape
    if n < 2:
        raise ValueError("compute_statistics needs n >= 2 samples (ddof=1)")

    # Generation-aware sizing (v7x: 64 MiB VMEM; v5e/v6e: 128 MiB).
    vmem_cap = _vmem_capacity_bytes()
    n_rt = 2 if d_pad >= 256 else 1            # parallel sigma row-tiles (v7x)
    tr = d_pad // n_rt                         # multiple of 128 by construction
    budget = int(vmem_cap * 0.55)
    tn_max = max(8, ((budget - 4 * tr * d_pad) // (8 * (tr + d_pad))) // 8 * 8)
    tn = max(8, min(2048, tn_max, _round_up(n, 8)))
    n_pad = _round_up(n, tn)
    if n_pad != n:
        # Zero rows (incl. their ones-lane) contribute nothing to the Gram.
        feats_pad = jnp.pad(feats_pad, ((0, n_pad - n), (0, 0)))

    needed = 4 * (tr * d_pad + 2 * tn * (tr + d_pad)) + (8 << 20)
    vmem_limit = int(max(32 << 20, min(needed, vmem_cap - (16 << 20))))

    gram = pl.pallas_call(
        _gram_kernel,
        out_shape=jax.ShapeDtypeStruct((d_pad, d_pad), jnp.float32),
        grid=(n_rt, n_pad // tn),
        in_specs=[
            pl.BlockSpec((tn, tr), lambda j, i: (i, j)),       # column slice (LHS)
            pl.BlockSpec((tn, d_pad), lambda j, i: (i, 0)),    # full rows (RHS)
        ],
        out_specs=pl.BlockSpec((tr, d_pad), lambda j, i: (j, 0)),
        compiler_params=pltpu.CompilerParams(
            dimension_semantics=("parallel", "arbitrary"),
            vmem_limit_bytes=vmem_limit),
    )(feats_pad, feats_pad)

    # O(D^2) finalize in plain XLA: the ones-lane row of G holds sum_n f[n, :].
    mu_full = gram[ones_lane] * (1.0 / n)
    # TODO(synk): one-pass (G - n*mu*mu^T)/(n-1) is cancellation-prone if a real
    # backbone with large feature means replaces the stand-in head; switch to a
    # centered/Welford formulation before swapping in Inception-v3.
    sigma_full = (gram - n * jnp.outer(mu_full, mu_full)) * (1.0 / (n - 1))
    return mu_full[:d_out], sigma_full[:d_out, :d_out]


class Statistics(NamedTuple):
    mu: jax.Array
    sigma: jax.Array


class Statistician:
    """JAX/Pallas counterpart of the PyTorch `Statistician` module."""

    def __init__(self, channels: int = 3, feat_dim: int = 64):
        key = jax.random.PRNGKey(0)
        self._channels = channels
        self._feat_dim = feat_dim
        # Pad the feature dim to a lane-dense width, reserving one spare lane
        # that carries a constant 1 (used by the Gram kernel to get mu for free).
        self._d_pad = _round_up(feat_dim + 1, LANE)
        self._ones_lane = feat_dim
        self._w = 0.02 * jax.random.normal(key, (channels, feat_dim), jnp.float32)
        b = np.zeros((1, self._d_pad), np.float32)
        b[0, self._ones_lane] = 1.0                     # constant-ones feature lane
        self._b = jnp.asarray(b)
        self._head_cache: dict[tuple[int, int], jax.Array] = {}
        self._features: list[jax.Array] = []

    def _folded_head(self, h: int, w: int) -> jax.Array:
        """One bf16 matrix folding bilinear-resize -> 299x299 GAP -> linear proj."""
        key = (h, w)
        if key not in self._head_cache:
            hsum = bilinear_matrix(h, OUT_HW).sum(axis=0)            # (H,)
            wsum = bilinear_matrix(w, OUT_HW).sum(axis=0)            # (W,)
            pool = np.outer(hsum, wsum) / float(OUT_HW * OUT_HW)     # (H, W)
            w_pad = np.zeros((self._channels, self._d_pad), np.float32)
            w_pad[:, :self._feat_dim] = np.asarray(self._w)
            m2 = (w_pad[:, None, None, :] * pool[None, :, :, None]).reshape(
                self._channels * h * w, self._d_pad)
            # TODO(synk): this fold only exists because the head is the GAP+linear
            # stand-in; the real Inception backbone needs the unfolded resize path.
            self._head_cache[key] = jnp.asarray(m2, dtype=jnp.bfloat16)
        return self._head_cache[key]

    def __call__(self, images: jax.Array) -> None:
        _, c, h, w = images.shape
        assert c == self._channels
        m2 = self._folded_head(h, w)
        feats = extract_features(images, m2, self._b)    # (N, D_pad) f32
        self._features.append(feats)

    def summarize(self) -> Statistics:
        # TODO(synk): torch.distributed.all_gather_object is single-process here.
        feats = jnp.concatenate(self._features, axis=0)
        mu, sigma = compute_statistics(feats, self._feat_dim, self._ones_lane)
        return Statistics(mu=mu, sigma=sigma)


# ---------------------------------------------------------------------------
# Main
# ---------------------------------------------------------------------------
if __name__ == "__main__":
    batch, channels, spatial, feat_dim = 2, 3, 16, 64

    key = jax.random.PRNGKey(0)
    k1, k2 = jax.random.split(key)
    # Images fed in native (narrow) dtype — no wrapper-side f32 upcast pass.
    imgs1 = jax.random.uniform(
        k1, (batch, channels, spatial, spatial), jnp.float32, 0.0, 255.0
    ).astype(jnp.bfloat16)
    imgs2 = jax.random.uniform(
        k2, (batch, channels, spatial, spatial), jnp.float32, 0.0, 255.0
    ).astype(jnp.bfloat16)

    stat = Statistician(channels=channels, feat_dim=feat_dim)
    stat(imgs1)   # forward() accumulates features, returns None (like the module)
    stat(imgs2)
    stats = stat.summarize()
    jax.block_until_ready((stats.mu, stats.sigma))

    # --- sanity: fused normalize+resize+pool+project vs f32 JAX reference ---
    imgs = jnp.concatenate([imgs1, imgs2], axis=0).astype(jnp.float32)
    lh_f = jnp.asarray(bilinear_matrix(spatial, OUT_HW))
    lw_f = jnp.asarray(bilinear_matrix(spatial, OUT_HW))
    xn = (imgs - 127.5) / 127.5
    resized = jnp.einsum("oh,nchw,pw->ncop", lh_f, xn, lw_f,
                         precision=lax.Precision.HIGHEST)
    pooled = resized.mean(axis=(2, 3))
    ref_feats = pooled @ stat._w
    feats_all = jnp.concatenate(stat._features, axis=0)
    feats_kernel = feats_all[:, :feat_dim]
    assert jnp.allclose(feats_kernel, ref_feats, atol=2e-3, rtol=2e-2)
    assert jnp.all(feats_all[:, feat_dim] == 1.0)          # constant-ones lane
    assert jnp.all(feats_all[:, feat_dim + 1:] == 0.0)     # padded lanes exactly zero

    # --- sanity: tiled Gram/statistics kernel vs jnp reference --------------
    ref_mu = feats_kernel.mean(0)
    ref_sigma = jnp.cov(feats_kernel, rowvar=False)
    assert jnp.allclose(stats.mu, ref_mu, atol=1e-4, rtol=1e-4)
    assert jnp.allclose(stats.sigma, ref_sigma, atol=1e-4, rtol=1e-4)

    print("KERNEL_OK")
</pallas_src>

<mosaic_0001>
module attributes {stable_mosaic.version = 11 : i64} {
  func.func @_feature_kernel(%arg0: i32, %arg1: memref<768x128xbf16, #tpu.memory_space<vmem>>, %arg2: memref<1x128xf32, #tpu.memory_space<vmem>>, %arg3: memref<8x768xbf16, #tpu.memory_space<vmem>>, %arg4: memref<8x128xf32, #tpu.memory_space<vmem>>) attributes {dimension_semantics = [#tpu.dimension_semantics<parallel>], iteration_bounds = array<i64: 1>, scalar_prefetch = 0 : i64, scratch_operands = 0 : i64, tpu.core_type = #tpu.core_type<tc>, window_params = [{pipeline_mode = #tpu.pipeline_mode<synchronous>, transform_indices = @transform_0, window_bounds = array<i64: 768, 128>}, {pipeline_mode = #tpu.pipeline_mode<synchronous>, transform_indices = @transform_1, window_bounds = array<i64: 1, 128>}, {transform_indices = @transform_2, window_bounds = array<i64: 8, 768>}, {transform_indices = @transform_3, window_bounds = array<i64: 8, 128>}]} {
    %c0 = arith.constant 0 : index
    %c0_0 = arith.constant 0 : index
    %0 = vector.load %arg3[%c0, %c0_0] : memref<8x768xbf16, #tpu.memory_space<vmem>>, vector<8x768xbf16>
    %1 = arith.extf %0 : vector<8x768xbf16> to vector<8x768xf32>
    %cst = arith.constant 1.275000e+02 : f32
    %2 = vector.broadcast %cst : f32 to vector<8x768xf32>
    %3 = arith.subf %1, %2 : vector<8x768xf32>
    %cst_1 = arith.constant 0.00784313772 : f32
    %4 = vector.broadcast %cst_1 : f32 to vector<8x768xf32>
    %5 = arith.mulf %3, %4 : vector<8x768xf32>
    %6 = arith.truncf %5 : vector<8x768xf32> to vector<8x768xbf16>
    %c0_2 = arith.constant 0 : index
    %c0_3 = arith.constant 0 : index
    %7 = vector.load %arg1[%c0_2, %c0_3] : memref<768x128xbf16, #tpu.memory_space<vmem>>, vector<768x128xbf16>
    %cst_4 = arith.constant dense<0.000000e+00> : vector<8x128xf32>
    %8 = tpu.matmul %6, %7, %cst_4 {dimension_numbers = #tpu.dot_dimension_numbers<[1], [0], [0], [1], [0, 0, 1, 1], [], []>} : vector<8x768xbf16>, vector<768x128xbf16>, vector<8x128xf32> -> vector<8x128xf32>
    %c0_5 = arith.constant 0 : index
    %c0_6 = arith.constant 0 : index
    %9 = vector.load %arg2[%c0_5, %c0_6] : memref<1x128xf32, #tpu.memory_space<vmem>>, vector<1x128xf32>
    %10 = vector.broadcast %9 : vector<1x128xf32> to vector<8x128xf32>
    %11 = arith.addf %8, %10 : vector<8x128xf32>
    %c0_7 = arith.constant 0 : index
    %c0_8 = arith.constant 0 : index
    %12 = vector.load %arg4[%c0_7, %c0_8] : memref<8x128xf32, #tpu.memory_space<vmem>>, vector<8x128xf32>
    tpu.vector_store %arg4[%c0_7, %c0_8], %11 {strides = array<i32>} : memref<8x128xf32, #tpu.memory_space<vmem>>, vector<8x128xf32>,
    return
  }
  func.func @transform_0(%arg0: i32) -> (i32, i32) {
    %c0_i32 = arith.constant 0 : i32
    %c0_i32_0 = arith.constant 0 : i32
    %c0_i32_1 = arith.constant 0 : i32
    return %c0_i32, %c0_i32_0 : i32, i32
  }
  func.func @transform_1(%arg0: i32) -> (i32, i32) {
    %c0_i32 = arith.constant 0 : i32
    %c0_i32_0 = arith.constant 0 : i32
    %c0_i32_1 = arith.constant 0 : i32
    return %c0_i32, %c0_i32_0 : i32, i32
  }
  func.func @transform_2(%arg0: i32) -> (i32, i32) {
    %c0_i32 = arith.constant 0 : i32
    %c0_i32_0 = arith.constant 0 : i32
    return %arg0, %c0_i32 : i32, i32
  }
  func.func @transform_3(%arg0: i32) -> (i32, i32) {
    %c0_i32 = arith.constant 0 : i32
    %c0_i32_0 = arith.constant 0 : i32
    return %arg0, %c0_i32 : i32, i32
  }
}

</mosaic_0001>

<bundles_post_ra>
// kernel: extract_features.1
= control target key start
LH: loop header
LB: loop body
LE: loop exit
PB: predicated region body
PF: predicated region fallthrough
CT: control target
= control target key end

     0   :  { %8 = vsyncpa [#allocation3], 0  ;;  %s805_s15 = smov [#allocation2]   ;;  %s806_s17 = smov 64   ;;  %s846_s0 = inlined_call_operand.hbm [shape: bf16[768,128], index: 0, kind: input, shape index: {}]   ;;  %s847_s1 = inlined_call_operand.vmem [shape: f32[1,128], index: 1, kind: input, shape index: {}]   ;;  %s848_s2 = inlined_call_operand.vmem [shape: bf16[8,768], index: 2, kind: input, shape index: {}]   ;;  %s849_s3 = inlined_call_operand.vmem [shape: f32[8,128], index: 3, kind: output, shape index: {}]  }
   0x1   :  { %s13_s14 = sshll.u32 %s846_s0, 4  ;;  %s15_s16 = sshll.u32 %s805_s15, 4  ;;  %s14_s14 = int_to_ptr.hbm [resolvable:$true] %s13_s14  ;;  %s16_s16 = int_to_ptr.vmem [resolvable:$true] %s15_s16 }
   0x2   :  { %s807_s18 = smov 4  }
   0x3   :  { %21 = dma.hbm_to_vmem [thread:$0]  %s14_s14, 6144, %s16_s16, [#allocation3], %s806_s17, %s806_s17, %s807_s18  }
   0x4   :  { %803 = dma.done.wait [#allocation3], 6144  }
   0x5   :  { %804 = vsyncadd [#allocation3], 4294961152  ;;  %v734_v0 = vld [vmem:[#allocation2 + $0x38] sm:$0xff]  ;;  %v733_v2 = vld [vmem:[#allocation2 + $0x30] sm:$0xff] }
   0x6   :  { %v742_v1 = vld [vmem:[#allocation2 + $0x78] sm:$0xff]  ;;  %445 = vmatpush.bf16.msra.mxu0 %v734_v0  ;;  %v741_v3 = vld [vmem:[#allocation2 + $0x70] sm:$0xff]  ;;  %v732_v8 = vld [vmem:[#allocation2 + $0x28] sm:$0xff] }
   0x7   :  { %458 = vmatpush.bf16.msra.mxu1 %v742_v1  ;;  %v750_v4 = vld [vmem:[#allocation2 + $0xb8] sm:$0xff]  ;;  %v749_v6 = vld [vmem:[#allocation2 + $0xb0] sm:$0xff]  ;;  %v740_v9 = vld [vmem:[#allocation2 + $0x68] sm:$0xff] }
   0x8   :  { %v758_v5 = vld [vmem:[#allocation2 + $0xf8] sm:$0xff]  ;;  %471 = vmatpush.bf16.msra.mxu2 %v750_v4  ;;  %v757_v7 = vld [vmem:[#allocation2 + $0xf0] sm:$0xff]  ;;  %v748_v10 = vld [vmem:[#allocation2 + $0xa8] sm:$0xff] }
   0x9   :  { %484 = vmatpush.bf16.msra.mxu3 %v758_v5  ;;  %v756_v11 = vld [vmem:[#allocation2 + $0xe8] sm:$0xff]  ;;  %v731_v12 = vld [vmem:[#allocation2 + $0x20] sm:$0xff]  ;;  %v730_v16 = vld [vmem:[#allocation2 + $0x18] sm:$0xff] }
   0xa   :  { %446 = vmatpush.bf16.msra.mxu0 %v733_v2  ;;  %v739_v13 = vld [vmem:[#allocation2 + $0x60] sm:$0xff]  ;;  %v738_v17 = vld [vmem:[#allocation2 + $0x58] sm:$0xff]  ;;  %v31_v23 = vld [vmem:[%s848_s2 + $0x8] sm:$0xff] }
   0xb   :  { %459 = vmatpush.bf16.msra.mxu1 %v741_v3  ;;  %v747_v14 = vld [vmem:[#allocation2 + $0xa0] sm:$0xff]  ;;  %v746_v19 = vld [vmem:[#allocation2 + $0x98] sm:$0xff]  ;;  %v729_v24 = vld [vmem:[#allocation2 + $0x10] sm:$0xff]  ;;  %v35_v28 = vunpack.c.l.bf16 %v31_v23  ;;  %v36_v29 = vunpack.c.h.bf16 %v31_v23 }
   0xc   :  { %472 = vmatpush.bf16.msra.mxu2 %v749_v6  ;;  %v755_v15 = vld [vmem:[#allocation2 + $0xe0] sm:$0xff]  ;;  %v754_v20 = vld [vmem:[#allocation2 + $0xd8] sm:$0xff]  ;;  %v737_v25 = vld [vmem:[#allocation2 + $0x50] sm:$0xff] }
   0xd   :  { %485 = vmatpush.bf16.msra.mxu3 %v757_v7  ;;  %v30_v18 = vld [vmem:[%s848_s2] sm:$0xff]  ;;  %v745_v26 = vld [vmem:[#allocation2 + $0x90] sm:$0xff]  ;;  %v728_v32 = vld [vmem:[#allocation2 + $0x8] sm:$0xff]  ;;  %v531_v36 = vadd.f32 -127.5, %v35_v28  ;;  %v532_v37 = vadd.f32 -127.5, %v36_v29 }
   0xe   :  { %447 = vmatpush.bf16.msra.mxu0 %v732_v8  ;;  %v33_v21 = vunpack.c.l.bf16 %v30_v18  ;;  %v34_v22 = vunpack.c.h.bf16 %v30_v18  ;;  %v753_v27 = vld [vmem:[#allocation2 + $0xd0] sm:$0xff]  ;;  %v736_v33 = vld [vmem:[#allocation2 + $0x48] sm:$0xff]  ;;  %v727_v40 = vld [vmem:[#allocation2] sm:$0xff] }
   0xf   :  { %460 = vmatpush.bf16.msra.mxu1 %v740_v9  ;;  %v744_v34 = vld [vmem:[#allocation2 + $0x88] sm:$0xff]  ;;  %v735_v41 = vld [vmem:[#allocation2 + $0x40] sm:$0xff]  ;;  %v766_v42 = vld [vmem:[#allocation2 + $0x138] sm:$0xff]  ;;  %v47_v46 = vmul.f32 0.007843138, %v531_v36 }
  0x10   :  { %473 = vmatpush.bf16.msra.mxu2 %v748_v10  ;;  %v529_v30 = vadd.f32 -127.5, %v33_v21  ;;  %v530_v31 = vadd.f32 -127.5, %v34_v22  ;;  %v752_v35 = vld [vmem:[#allocation2 + $0xc8] sm:$0xff]  ;;  %v774_v43 = vld [vmem:[#allocation2 + $0x178] sm:$0xff]  ;;  %v743_v44 = vld [vmem:[#allocation2 + $0x80] sm:$0xff] }
  0x11   :  { %486 = vmatpush.bf16.msra.mxu3 %v756_v11  ;;  %v751_v45 = vld [vmem:[#allocation2 + $0xc0] sm:$0xff]  ;;  %v48_v47 = vmul.f32 0.007843138, %v532_v37  ;;  %v765_v50 = vld [vmem:[#allocation2 + $0x130] sm:$0xff]  ;;  %v53_v52 = vpack.c.bf16 %v47_v46, %v47_v46  ;;  %v764_v54 = vld [vmem:[#allocation2 + $0x128] sm:$0xff] }
  0x12   :  { %448 = vmatpush.bf16.msra.mxu0 %v731_v12  ;;  %v45_v38 = vmul.f32 0.007843138, %v529_v30  ;;  %v46_v39 = vmul.f32 0.007843138, %v530_v31  ;;  %v773_v51 = vld [vmem:[#allocation2 + $0x170] sm:$0xff]  ;;  %v772_v55 = vld [vmem:[#allocation2 + $0x168] sm:$0xff] }
  0x13   :  { %461 = vmatpush.bf16.msra.mxu1 %v739_v13  ;;  %v54_v53 = vpack.c.bf16 %v48_v47, %v48_v47  ;;  %v763_v56 = vld [vmem:[#allocation2 + $0x120] sm:$0xff]  ;;  %v762_v58 = vld [vmem:[#allocation2 + $0x118] sm:$0xff]  ;;  %v32_v60 = vld [vmem:[%s848_s2 + $0x10] sm:$0xff] }
  0x14   :  { %474 = vmatpush.bf16.msra.mxu2 %v747_v14  ;;  %v51_v48 = vpack.c.bf16 %v45_v38, %v45_v38  ;;  %v52_v49 = vpack.c.bf16 %v46_v39, %v46_v39  ;;  %v771_v57 = vld [vmem:[#allocation2 + $0x160] sm:$0xff]  ;;  %v770_v59 = vld [vmem:[#allocation2 + $0x158] sm:$0xff]  ;;  %v37_v61 = vunpack.c.l.bf16 %v32_v60  ;;  %v38_v62 = vunpack.c.h.bf16 %v32_v60  ;;  %v761_v63 = vld [vmem:[#allocation2 + $0x110] sm:$0xff] }
  0x15   :  { %487 = vmatpush.bf16.msra.mxu3 %v755_v15  ;;  %v769_v0 = vld [vmem:[#allocation2 + $0x150] sm:$0xff]  ;;  %v760_v3 = vld [vmem:[#allocation2 + $0x108] sm:$0xff]  ;;  %v759_v7 = vld [vmem:[#allocation2 + $0x100] sm:$0xff] }
  0x16   :  { %449 = vmatpush.bf16.msra.mxu0 %v730_v16  ;;  %v533_v1 = vadd.f32 -127.5, %v37_v61  ;;  %v534_v2 = vadd.f32 -127.5, %v38_v62  ;;  %v768_v4 = vld [vmem:[#allocation2 + $0x148] sm:$0xff]  ;;  %v767_v8 = vld [vmem:[#allocation2 + $0x140] sm:$0xff] }
  0x17   :  { %462 = vmatpush.bf16.msra.mxu1 %v738_v17  ;;  %v778_v17 = vld [vmem:[%s847_s1] ss:$0 sm:$0xff] }
  0x18   :  { %475 = vmatpush.bf16.msra.mxu2 %v746_v19  ;;  %v49_v5 = vmul.f32 0.007843138, %v533_v1  ;;  %v50_v6 = vmul.f32 0.007843138, %v534_v2 }
  0x19   :  { %488 = vmatpush.bf16.msra.mxu3 %v754_v20 }
  0x1a   :  { %450 = vmatpush.bf16.msra.mxu0 %v729_v24  ;;  %v55_v9 = vpack.c.bf16 %v49_v5, %v49_v5  ;;  %v56_v10 = vpack.c.bf16 %v50_v6, %v50_v6 }
  0x1b   :  { %463 = vmatpush.bf16.msra.mxu1 %v737_v25 }
  0x1c   :  { %476 = vmatpush.bf16.msra.mxu2 %v745_v26 }
  0x1d   :  { %489 = vmatpush.bf16.msra.mxu3 %v753_v27 }
  0x1e   :  { %451 = vmatpush.bf16.msra.mxu0 %v728_v32 }
  0x1f   :  { %464 = vmatpush.bf16.msra.mxu1 %v736_v33 }
  0x20   :  { %477 = vmatpush.bf16.msra.mxu2 %v744_v34 }
  0x21   :  { %490 = vmatpush.bf16.msra.mxu3 %v752_v35 }
  0x22   :  { %452 = vmatpush.bf16.msra.mxu0 %v727_v40 }
  0x23   :  { %465 = vmatpush.bf16.msra.mxu1 %v735_v41 }
  0x24   :  { %478 = vmatpush.bf16.msra.mxu2 %v743_v44 }
  0x25   :  { %491 = vmatpush.bf16.msra.mxu3 %v751_v45  ;;  %453 = vmatmul.bf16.vlgmr.msra.gmra.mxu0 %v51_v48 }
  0x26   :  { %497 = vmatpush.bf16.msrb.mxu0 %v766_v42  ;;  %466 = vmatmul.bf16.vlgmr.msra.gmra.mxu1 %v52_v49 }
  0x27   :  { %510 = vmatpush.bf16.msrb.mxu1 %v774_v43  ;;  %479 = vmatmul.bf16.vlgmr.msra.gmra.mxu2 %v53_v52 }
  0x28   :  { %492 = vmatmul.bf16.vlgmr.msra.gmra.mxu3 %v54_v53 }
  0x2a   :  { %498 = vmatpush.bf16.msrb.mxu0 %v765_v50 }
  0x2b   :  { %511 = vmatpush.bf16.msrb.mxu1 %v773_v51 }
  0x2e   :  { %499 = vmatpush.bf16.msrb.mxu0 %v764_v54 }
  0x2f   :  { %512 = vmatpush.bf16.msrb.mxu1 %v772_v55 }
  0x32   :  { %500 = vmatpush.bf16.msrb.mxu0 %v763_v56 }
  0x33   :  { %513 = vmatpush.bf16.msrb.mxu1 %v771_v57 }
  0x36   :  { %501 = vmatpush.bf16.msrb.mxu0 %v762_v58 }
  0x37   :  { %514 = vmatpush.bf16.msrb.mxu1 %v770_v59 }
  0x3a   :  { %502 = vmatpush.bf16.msrb.mxu0 %v761_v63 }
  0x3b   :  { %515 = vmatpush.bf16.msrb.mxu1 %v769_v0 }
  0x3e   :  { %503 = vmatpush.bf16.msrb.mxu0 %v760_v3 }
  0x3f   :  { %516 = vmatpush.bf16.msrb.mxu1 %v768_v4 }
  0x42   :  { %504 = vmatpush.bf16.msrb.mxu0 %v759_v7 }
  0x43   :  { %517 = vmatpush.bf16.msrb.mxu1 %v767_v8 }
  0x45   :  { %505 = vmatmul.bf16.vlgmr.msrb.gmra.mxu0 %v55_v9 }
  0x46   :  { %518 = vmatmul.bf16.vlgmr.msrb.gmra.mxu1 %v56_v10 }
  0xa2   :  { %v454_v11 = vpop.f32.mrf.mxu0 }
  0xa3   :  { %v467_v12 = vpop.f32.mrf.mxu1  ;;  %v455_v18 = vadd.f32 %v778_v17, %v454_v11 }
  0xa5   :  { %v468_v21 = vadd.f32 %v467_v12, %v455_v18 }
  0xaa   :  { %v456_v13 = vpop.f32.mrf.mxu0  ;;  %v480_v15 = vpop.f32.mrf.mxu2 }
  0xab   :  { %v469_v14 = vpop.f32.mrf.mxu1  ;;  %v493_v16 = vpop.f32.mrf.mxu3  ;;  %v481_v22 = vadd.f32 %v480_v15, %v468_v21 }
  0xad   :  { %v494_v23 = vadd.f32 %v493_v16, %v481_v22 }
  0xb2   :  { %v482_v19 = vpop.f32.mrf.mxu2 }
  0xb3   :  { %v495_v20 = vpop.f32.mrf.mxu3 }
  0xc2   :  { %v506_v24 = vpop.f32.mrf.mxu0 }
  0xc3   :  { %v519_v25 = vpop.f32.mrf.mxu1  ;;  %v507_v26 = vadd.f32 %v506_v24, %v494_v23 }
  0xc5   :  { %v520_v27 = vadd.f32 %v519_v25, %v507_v26 }
  0xc7   :  { %523 = vst [vmem:[%s849_s3] sm:$0xff] %v520_v27 }
  0xca   :  { %v508_v28 = vpop.f32.mrf.mxu0 }
  0xcb   :  { %v521_v29 = vpop.f32.mrf.mxu1 }
  0xcc   :  { %528 = vsyncpa [#allocation3], 1 }

</bundles_post_ra>
